<compile_context>
chip_gen: v7x
topology: tpu7x:2x2x1
jax: 0.10.0
libtpu: 0.0.40
codegen_flags: <defaults>
</compile_context>

<pallas_src>
import functools

import jax
import jax.numpy as jnp
from jax.experimental import pallas as pl
from jax.experimental.pallas import tpu as pltpu

IGNORE_INDEX = -100

# Large finite negative used for masked/invalid columns and the running-max
# init: never wins a max against real logits, and exp(fill - max) underflows to
# exactly 0 without the -inf - (-inf) = NaN hazard.
_NEG_FILL = -1.7e38


def _ceil_to(x, m):
    return ((x + m - 1) // m) * m


def _memory_plan():
    """Return (block_budget_bytes, vmem_limit_bytes, num_tensorcores)."""
    vmem_cap = 64 * 1024 * 1024  # conservative default if query fails
    try:
        info = pltpu.get_tpu_info()
        vmem_cap = int(getattr(info, "vmem_capacity_bytes", vmem_cap))
    except Exception:
        pass
    if vmem_cap <= 80 * 1024 * 1024:
        # v7x-class: 64 MiB VMEM per TensorCore, 2 TCs per chip.
        return 14 * 1024 * 1024, 44 * 1024 * 1024, 2
    # v5e / v6e: 128 MiB VMEM, single TensorCore.
    return 28 * 1024 * 1024, 48 * 1024 * 1024, 1


# --------------------------------------------------------------------------- #
# Kernel A: whole vocab partition per row tile (preferred path).
# --------------------------------------------------------------------------- #
def _ce_single_pass_kernel(
    logits_ref,   # (TR, V)  logits, native dtype (V == full vocab dim)
    tgt_ref,      # (TR, 1)  int32 targets
    loss_ref,     # (TR, 1)  f32 per-token loss
    *,
    vocab_size,
    label_smoothing,
    ignore_index,
):
    x = logits_ref[...]                                   # native dtype
    tgt = tgt_ref[...]                                    # (TR, 1) int32

    # row max in native dtype; exp path in f32
    m_f = x.max(axis=-1, keepdims=True).astype(jnp.float32)       # (TR, 1)
    shifted = x.astype(jnp.float32) - m_f                          # (TR, V) f32
    sum_exp = jnp.exp(shifted).sum(axis=-1, keepdims=True)
    log_sum = jnp.log(sum_exp)

    # target-column gather via compare/select (single nonzero per row)
    target_mask = (tgt < 0) | (tgt >= vocab_size)
    masked_target = jnp.where(target_mask, 0, tgt)                 # (TR, 1)
    cols = jax.lax.broadcasted_iota(jnp.int32, x.shape, 1)
    sel = cols == masked_target
    pred_raw = jnp.where(sel, x, jnp.zeros_like(x)).sum(
        axis=-1, keepdims=True).astype(jnp.float32)
    pred = jnp.where(target_mask, 0.0, pred_raw - m_f)

    loss = log_sum - pred
    loss = jnp.where(tgt == ignore_index, 0.0, loss)

    if label_smoothing > 0.0:
        smoothing = label_smoothing * vocab_size / (vocab_size - 1)
        mean_log_probs = shifted.sum(axis=-1, keepdims=True) / vocab_size - log_sum
        loss = (1.0 - smoothing) * loss - smoothing * mean_log_probs

    loss_ref[...] = loss.astype(loss_ref.dtype)


# --------------------------------------------------------------------------- #
# Kernel B: tiled vocab with online softmax (fallback for huge vocab shards).
# --------------------------------------------------------------------------- #
def _ce_tiled_kernel(
    logits_ref,   # (TR, TV)
    tgt_ref,      # (TR, 1) int32
    loss_ref,     # (TR, 1) f32
    m_sc,         # (TR, 1) running max (f32)
    l_sc,         # (TR, 1) running sum exp
    pred_sc,      # (TR, 1) raw target logit
    sum_sc,       # (TR, 1) raw logit sum (label smoothing only)
    *,
    vocab_size,
    tv,
    needs_col_mask,
    label_smoothing,
    ignore_index,
):
    kv = pl.program_id(1)

    @pl.when(kv == 0)
    def _init():
        # Finite init (not -inf): exp(m_prev - m_new) can never produce NaN.
        m_sc[...] = jnp.full_like(m_sc, _NEG_FILL)
        l_sc[...] = jnp.zeros_like(l_sc)
        pred_sc[...] = jnp.zeros_like(pred_sc)
        if label_smoothing > 0.0:
            sum_sc[...] = jnp.zeros_like(sum_sc)

    x = logits_ref[...]                                   # native dtype
    tgt = tgt_ref[...]
    cols = jax.lax.broadcasted_iota(jnp.int32, x.shape, 1)

    xf = x.astype(jnp.float32)
    if needs_col_mask:
        # Last vocab tile is ragged (out-of-bounds lanes hold garbage): mask
        # them with a large finite negative so they never win the max and
        # exp(fill - m) underflows to exactly 0 (no NaN).
        valid = cols < (vocab_size - kv * tv)
        xf = jnp.where(valid, xf, _NEG_FILL)

    # online softmax statistics (all f32)
    tile_max = xf.max(axis=-1, keepdims=True)
    m_prev = m_sc[...]
    m_new = jnp.maximum(m_prev, tile_max)
    alpha = jnp.exp(m_prev - m_new)
    p = jnp.exp(xf - m_new)
    l_sc[...] = alpha * l_sc[...] + p.sum(axis=-1, keepdims=True)
    m_sc[...] = m_new

    # target-column select: per-row shifted target vs. local column iota
    target_mask = (tgt < 0) | (tgt >= vocab_size)
    masked_target = jnp.where(target_mask, 0, tgt)
    local_target = masked_target - kv * tv                # (TR, 1)
    sel = cols == local_target
    pred_sc[...] += jnp.where(sel, x, jnp.zeros_like(x)).sum(
        axis=-1, keepdims=True).astype(jnp.float32)

    if label_smoothing > 0.0:
        xs = x.astype(jnp.float32)
        if needs_col_mask:
            xs = jnp.where(valid, xs, 0.0)
        sum_sc[...] += xs.sum(axis=-1, keepdims=True)

    @pl.when(kv == pl.num_programs(1) - 1)
    def _finalize():
        log_l = jnp.log(l_sc[...])
        pred = jnp.where(target_mask, 0.0, pred_sc[...] - m_sc[...])
        loss = log_l - pred
        loss = jnp.where(tgt == ignore_index, 0.0, loss)
        if label_smoothing > 0.0:
            smoothing = label_smoothing * vocab_size / (vocab_size - 1)
            mean_log_probs = sum_sc[...] / vocab_size - m_sc[...] - log_l
            loss = (1.0 - smoothing) * loss - smoothing * mean_log_probs
        loss_ref[...] = loss.astype(loss_ref.dtype)


# --------------------------------------------------------------------------- #
# Tile planning + wrapper.
# --------------------------------------------------------------------------- #
def _plan_tiles(n_rows, vocab, itemsize, budget, num_cores):
    """Pick (single_pass, tr, tv) fitting the VMEM block budget.

    Per-element VMEM bytes: 2*itemsize for the double-buffered input block plus
    ~8 bytes for the f32 shifted/exp working set formed inside the body.
    """
    vp_full = _ceil_to(vocab, 128)
    per_elem = 2 * itemsize + 8
    tr_max = (budget // (per_elem * vp_full)) // 8 * 8
    if tr_max >= 8:
        tr = min(tr_max, 512)
        if num_cores > 1 and n_rows >= 8 * 2 * num_cores:
            # Keep >= 2*num_cores row tiles so every TensorCore gets work (v7x).
            tr = min(tr, max(8, (n_rows // (2 * num_cores)) // 8 * 8))
        tr = max(8, min(tr, _ceil_to(n_rows, 8)))
        return True, tr, vocab
    # Vocab shard too large even for tr=8: tile the vocab axis (online softmax).
    tr = max(8, min(256, _ceil_to(n_rows, 8)))
    tv = (budget // (per_elem * tr)) // 128 * 128
    tv = max(128, min(tv, vp_full))
    return False, tr, tv


def vocab_parallel_cross_entropy(
    vocab_parallel_logits,
    target,
    *,
    label_smoothing=0.0,
    reduction="mean",
    ignore_index=IGNORE_INDEX,
    vmem_block_budget=None,
):
    """Forward of CrossEntropyApexVocabParallel (process_group=None)."""
    assert reduction in ("mean", "none")
    orig_target_shape = target.shape
    V = vocab_parallel_logits.shape[-1]
    logits_2d = vocab_parallel_logits.reshape(-1, V)
    tgt_2d = target.reshape(-1, 1).astype(jnp.int32)
    N = logits_2d.shape[0]
    itemsize = jnp.dtype(logits_2d.dtype).itemsize

    budget, vmem_limit, num_cores = _memory_plan()
    if vmem_block_budget is not None:
        budget = vmem_block_budget

    single_pass, tr, tv = _plan_tiles(N, V, itemsize, budget, num_cores)
    n_row_blocks = pl.cdiv(N, tr)

    cost = pl.CostEstimate(
        flops=int(6 * N * V),
        transcendentals=int(N * V),
        bytes_accessed=int(N * V * itemsize + N * 8),
    )

    if single_pass:
        kernel = functools.partial(
            _ce_single_pass_kernel,
            vocab_size=V,
            label_smoothing=float(label_smoothing),
            ignore_index=ignore_index,
        )
        grid_spec = pltpu.PrefetchScalarGridSpec(
            num_scalar_prefetch=0,
            grid=(n_row_blocks,),
            in_specs=[
                pl.BlockSpec((tr, V), lambda r: (r, 0)),
                pl.BlockSpec((tr, 1), lambda r: (r, 0)),
            ],
            out_specs=pl.BlockSpec((tr, 1), lambda r: (r, 0)),
            scratch_shapes=[],
        )
        dim_sem = ("parallel",)
    else:
        n_vocab_blocks = pl.cdiv(V, tv)
        kernel = functools.partial(
            _ce_tiled_kernel,
            vocab_size=V,
            tv=tv,
            needs_col_mask=(V % tv != 0),
            label_smoothing=float(label_smoothing),
            ignore_index=ignore_index,
        )
        grid_spec = pltpu.PrefetchScalarGridSpec(
            num_scalar_prefetch=0,
            grid=(n_row_blocks, n_vocab_blocks),
            in_specs=[
                pl.BlockSpec((tr, tv), lambda r, k: (r, k)),
                pl.BlockSpec((tr, 1), lambda r, k: (r, 0)),
            ],
            out_specs=pl.BlockSpec((tr, 1), lambda r, k: (r, 0)),
            scratch_shapes=[pltpu.VMEM((tr, 1), jnp.float32)] * 4,
        )
        dim_sem = ("parallel", "arbitrary")

    loss_2d = pl.pallas_call(
        kernel,
        out_shape=jax.ShapeDtypeStruct((N, 1), jnp.float32),
        grid_spec=grid_spec,
        compiler_params=pltpu.CompilerParams(
            dimension_semantics=dim_sem,
            vmem_limit_bytes=vmem_limit,
        ),
        cost_estimate=cost,
    )(logits_2d, tgt_2d)

    loss = loss_2d[:, 0].reshape(orig_target_shape)
    if reduction == "mean":
        n_valid = (target != ignore_index).sum().astype(jnp.float32)
        return loss.sum() / n_valid
    return loss


# --------------------------------------------------------------------------- #
# Pure-JAX reference (port of _VocabParallelCrossEntropy.forward, 1 partition).
# --------------------------------------------------------------------------- #
def _reference(logits, target, label_smoothing=0.0, ignore_index=IGNORE_INDEX):
    logits = logits.astype(jnp.float32)
    V = logits.shape[-1]
    m = logits.max(axis=-1)
    shifted = logits - m[..., None]
    target_mask = (target < 0) | (target >= V)
    ignore = target == ignore_index
    mt = jnp.where(target_mask, 0, target)
    pred = jnp.take_along_axis(shifted, mt[..., None], axis=-1)[..., 0]
    pred = jnp.where(target_mask, 0.0, pred)
    sum_exp = jnp.exp(shifted).sum(axis=-1)
    loss = jnp.log(sum_exp) - pred
    loss = jnp.where(ignore, 0.0, loss)
    if label_smoothing > 0.0:
        smoothing = label_smoothing * V / (V - 1)
        log_probs = shifted - jnp.log(sum_exp)[..., None]
        mean_lp = log_probs.mean(axis=-1)
        loss = (1.0 - smoothing) * loss - smoothing * mean_lp
    return loss


if __name__ == "__main__":
    key = jax.random.PRNGKey(0)
    k_logits, k_tgt, k_logits2, k_tgt2 = jax.random.split(key, 4)

    # Small shapes: batch=2, seq=8, vocab(partition)=256.
    B, S, V = 2, 8, 256
    logits = jax.random.normal(k_logits, (B, S, V), dtype=jnp.float32) * 2.0
    target = jax.random.randint(k_tgt, (B, S), 0, V, dtype=jnp.int32)
    target = target.at[0, 0].set(IGNORE_INDEX)
    target = target.at[1, 3].set(IGNORE_INDEX)

    # 1) single-pass path, reduction='none', no smoothing
    loss_none = vocab_parallel_cross_entropy(
        logits, target, label_smoothing=0.0, reduction="none")
    jax.block_until_ready(loss_none)
    ref_none = _reference(logits, target, 0.0)
    assert jnp.allclose(loss_none, ref_none, atol=1e-4, rtol=1e-4)

    # 2) single-pass path, reduction='mean' (module default) + label smoothing
    loss_mean = vocab_parallel_cross_entropy(
        logits, target, label_smoothing=0.1, reduction="mean")
    jax.block_until_ready(loss_mean)
    ref_ls = _reference(logits, target, 0.1)
    ref_mean = ref_ls.sum() / (target != IGNORE_INDEX).sum().astype(jnp.float32)
    assert jnp.allclose(loss_mean, ref_mean, atol=1e-4, rtol=1e-4)

    # 3) force the tiled-vocab (online softmax) fallback via a tiny block budget
    loss_tiled = vocab_parallel_cross_entropy(
        logits, target, label_smoothing=0.1, reduction="none",
        vmem_block_budget=8 * 1024)
    jax.block_until_ready(loss_tiled)
    assert jnp.allclose(loss_tiled, ref_ls, atol=1e-4, rtol=1e-4)

    # 4) bf16 logits exercise the mixed-precision path
    logits_bf16 = logits.astype(jnp.bfloat16)
    loss_bf16 = vocab_parallel_cross_entropy(
        logits_bf16, target, label_smoothing=0.0, reduction="none")
    jax.block_until_ready(loss_bf16)
    ref_bf16 = _reference(logits_bf16, target, 0.0)
    assert jnp.allclose(loss_bf16, ref_bf16, atol=2e-3, rtol=2e-3)

    # 5) ragged rows / non-128 vocab: N=13 tokens, V=200 (no host-side padding)
    N2, V2 = 13, 200
    logits_r = jax.random.normal(k_logits2, (N2, V2), dtype=jnp.float32) * 2.0
    target_r = jax.random.randint(k_tgt2, (N2,), 0, V2, dtype=jnp.int32)
    target_r = target_r.at[5].set(IGNORE_INDEX)
    ref_r = _reference(logits_r, target_r, 0.1)

    loss_r = vocab_parallel_cross_entropy(
        logits_r, target_r, label_smoothing=0.1, reduction="none")
    jax.block_until_ready(loss_r)
    assert jnp.allclose(loss_r, ref_r, atol=1e-4, rtol=1e-4)

    # 5b) same shapes through the tiled fallback (exercises in-kernel col mask)
    loss_r_tiled = vocab_parallel_cross_entropy(
        logits_r, target_r, label_smoothing=0.1, reduction="none",
        vmem_block_budget=8 * 1024)
    jax.block_until_ready(loss_r_tiled)
    assert jnp.allclose(loss_r_tiled, ref_r, atol=1e-4, rtol=1e-4)

    print("KERNEL_OK")
</pallas_src>

<mosaic_0001>
module attributes {stable_mosaic.version = 11 : i64} {
  func.func @_ce_single_pass_kernel(%arg0: i32, %arg1: memref<16x256xf32, #tpu.memory_space<vmem>>, %arg2: memref<16x1xi32, #tpu.memory_space<vmem>>, %arg3: memref<16x1xf32, #tpu.memory_space<vmem>>) attributes {dimension_semantics = [#tpu.dimension_semantics<parallel>], iteration_bounds = array<i64: 1>, scalar_prefetch = 0 : i64, scratch_operands = 0 : i64, tpu.core_type = #tpu.core_type<tc>, window_params = [{transform_indices = @transform_0, window_bounds = array<i64: 16, 256>}, {transform_indices = @transform_1, window_bounds = array<i64: 16, 1>}, {transform_indices = @transform_2, window_bounds = array<i64: 16, 1>}]} {
    %c0 = arith.constant 0 : index
    %c0_0 = arith.constant 0 : index
    %0 = vector.load %arg1[%c0, %c0_0] : memref<16x256xf32, #tpu.memory_space<vmem>>, vector<16x256xf32>
    %c0_1 = arith.constant 0 : index
    %c0_2 = arith.constant 0 : index
    %1 = vector.load %arg2[%c0_1, %c0_2] : memref<16x1xi32, #tpu.memory_space<vmem>>, vector<16x1xi32>
    %cst = arith.constant dense<0xFF800000> : vector<16xf32>
    %2 = vector.multi_reduction <maximumf>, %0, %cst [1] : vector<16x256xf32> to vector<16xf32>
    %3 = vector.shape_cast %2 : vector<16xf32> to vector<16x1xf32>
    %4 = vector.broadcast %3 : vector<16x1xf32> to vector<16x256xf32>
    %5 = arith.subf %0, %4 : vector<16x256xf32>
    %6 = math.exp %5 : vector<16x256xf32>
    %cst_3 = arith.constant dense<0.000000e+00> : vector<16xf32>
    %7 = vector.multi_reduction <add>, %6, %cst_3 [1] : vector<16x256xf32> to vector<16xf32>
    %8 = vector.shape_cast %7 : vector<16xf32> to vector<16x1xf32>
    %9 = math.log %8 : vector<16x1xf32>
    %c0_i32 = arith.constant 0 : i32
    %10 = vector.broadcast %c0_i32 : i32 to vector<16x1xi32>
    %11 = arith.cmpi slt, %1, %10 : vector<16x1xi32>
    %c256_i32 = arith.constant 256 : i32
    %12 = vector.broadcast %c256_i32 : i32 to vector<16x1xi32>
    %13 = arith.cmpi sge, %1, %12 : vector<16x1xi32>
    %14 = arith.ori %11, %13 : vector<16x1xi1>
    %c0_i32_4 = arith.constant 0 : i32
    %15 = vector.broadcast %c0_i32_4 : i32 to vector<16x1xi32>
    %16 = arith.select %14, %15, %1 : vector<16x1xi1>, vector<16x1xi32>
    %17 = tpu.iota {dimensions = array<i32: 1>} : vector<16x256xi32>
    %18 = vector.broadcast %16 : vector<16x1xi32> to vector<16x256xi32>
    %19 = arith.cmpi eq, %17, %18 : vector<16x256xi32>
    %cst_5 = arith.constant 0.000000e+00 : f32
    %20 = vector.broadcast %cst_5 : f32 to vector<16x256xf32>
    %21 = arith.select %19, %0, %20 : vector<16x256xi1>, vector<16x256xf32>
    %cst_6 = arith.constant dense<0.000000e+00> : vector<16xf32>
    %22 = vector.multi_reduction <add>, %21, %cst_6 [1] : vector<16x256xf32> to vector<16xf32>
    %23 = vector.shape_cast %22 : vector<16xf32> to vector<16x1xf32>
    %24 = arith.subf %23, %3 : vector<16x1xf32>
    %cst_7 = arith.constant 0.000000e+00 : f32
    %25 = vector.broadcast %cst_7 : f32 to vector<16x1xf32>
    %26 = arith.select %14, %25, %24 : vector<16x1xi1>, vector<16x1xf32>
    %27 = arith.subf %9, %26 : vector<16x1xf32>
    %c-100_i32 = arith.constant -100 : i32
    %28 = vector.broadcast %c-100_i32 : i32 to vector<16x1xi32>
    %29 = arith.cmpi eq, %1, %28 : vector<16x1xi32>
    %cst_8 = arith.constant 0.000000e+00 : f32
    %30 = vector.broadcast %cst_8 : f32 to vector<16x1xf32>
    %31 = arith.select %29, %30, %27 : vector<16x1xi1>, vector<16x1xf32>
    %c0_9 = arith.constant 0 : index
    %c0_10 = arith.constant 0 : index
    %32 = vector.load %arg3[%c0_9, %c0_10] : memref<16x1xf32, #tpu.memory_space<vmem>>, vector<16x1xf32>
    tpu.vector_store %arg3[%c0_9, %c0_10], %31 {strides = array<i32>} : memref<16x1xf32, #tpu.memory_space<vmem>>, vector<16x1xf32>,
    return
  }
  func.func @transform_0(%arg0: i32) -> (i32, i32) {
    %c0_i32 = arith.constant 0 : i32
    %c0_i32_0 = arith.constant 0 : i32
    return %arg0, %c0_i32 : i32, i32
  }
  func.func @transform_1(%arg0: i32) -> (i32, i32) {
    %c0_i32 = arith.constant 0 : i32
    %c0_i32_0 = arith.constant 0 : i32
    return %arg0, %c0_i32 : i32, i32
  }
  func.func @transform_2(%arg0: i32) -> (i32, i32) {
    %c0_i32 = arith.constant 0 : i32
    %c0_i32_0 = arith.constant 0 : i32
    return %arg0, %c0_i32 : i32, i32
  }
}

</mosaic_0001>

<bundles_post_ra>
// kernel: tpu_custom_call.1
= control target key start
LH: loop header
LB: loop body
LE: loop exit
PB: predicated region body
PF: predicated region fallthrough
CT: control target
= control target key end

     0   :  { %7 = vsyncpa [#allocation3], 0  ;;  %s150_s9 = smov [#allocation2]   ;;  %s221_s0 = inlined_call_operand.hbm [shape: f32[16,256], index: 0, kind: input, shape index: {}]   ;;  %s222_s1 = inlined_call_operand.vmem [shape: s32[16,1], index: 1, kind: input, shape index: {}]   ;;  %s223_s2 = inlined_call_operand.vmem [shape: f32[16,1], index: 2, kind: output, shape index: {}]  }
   0x1   :  { %s13_s10 = sshll.u32 %s150_s9, 4  ;;  %s126_s13 = scalar_lea.hbm %s221_s0, 512  ;;  %s14_s10 = int_to_ptr.vmem [resolvable:$true] %s13_s10 }
   0x2   :  { %p127_p0 = scmp.ne.s32.totalorder %s221_s0, %s126_s13  ;;  %p130_p1 = scmp.lt.u32.totalorder %s126_s13, %s221_s0 }
   0x4   :  { %p132_p2 = pnand %p130_p1, %p127_p0 }
   0x6   :  { %135 = shalt.err (!%p132_p2)
}
   0x7   :  { %s136_s18 = scalar_lea.vmem %s14_s10, 512  ;;  %p141_p4 = scmp.lt.s32.totalorder %s14_s10, %s14_s10 }
   0x8   :  { %p137_p3 = scmp.ne.s32.totalorder %s14_s10, %s136_s18  ;;  %p142_p5 = scmp.lt.s32.totalorder %s136_s18, %s136_s18 }
   0xa   :  { %p143_p6 = por %p142_p5, %p141_p4 }
   0xc   :  { %p144_p7 = pnand %p143_p6, %p137_p3 }
   0xe   :  { %147 = shalt.err (!%p144_p7)
}
   0xf   :  { %s151_s19 = smov 256   ;;  %s152_s20 = smov 16  }
  0x10   :  { %19 = dma.hbm_to_vmem [thread:$0]  %s221_s0, 512, %s14_s10, [#allocation3], %s151_s19, %s151_s19, %s152_s20  }
  0x11   :  { %148 = dma.done.wait [#allocation3], 512  }
  0x12   :  { %149 = vsyncadd [#allocation3], 4294966784  ;;  %v153_v0 = vmov 0   ;;  %v25_v1 = vld [vmem:[#allocation2] sm:$0xff]  ;;  %v26_v2 = vld [vmem:[#allocation2 + $0x8] sm:$0xff]  ;;  %v67_v16 = vlaneseq  ;;  %vm100_vm11 = vcmask 7168  }
  0x13   :  { %112 = vset.pattern.permute.xlu1 %v153_v0  ;;  %113 = vset.pattern.permute.xlu0 %v153_v0  ;;  %v27_v3 = vld [vmem:[#allocation2 + $0x10] sm:$0xff]  ;;  %v31_v4 = vmax.f32 %v25_v1, %v26_v2  ;;  %v28_v5 = vld [vmem:[#allocation2 + $0x18] sm:$0xff]  ;;  %v184_v6 = vld [vmem:[%s222_s1] sm:$0xff] }
  0x14   :  { %v189_v7 = vld [vmem:[%s222_s1 + $0x8] sm:$0xff]  ;;  %vm59_vm0 = vcmp.lt.s32.totalorder %v184_v6, 0  ;;  %vm61_vm1 = vcmp.ge.s32.totalorder %v184_v6, 256  ;;  %v34_v8 = vmax.f32 %v27_v3, %v28_v5  ;;  %v68_v22 = vand.u32 127, %v67_v16 }
  0x15   :  { %vm60_vm2 = vcmp.lt.s32.totalorder %v189_v7, 0  ;;  %32 = vmax.xlane.f32.xlu0 %v31_v4  ;;  %vm194_vm3 = vmor %vm59_vm0, %vm61_vm1  ;;  %vm62_vm4 = vcmp.ge.s32.totalorder %v189_v7, 256  ;;  %vm96_vm10 = vcmp.eq.s32.totalorder %v184_v6, 4294967196  ;;  %vm97_vm12 = vcmp.eq.s32.totalorder %v189_v7, 4294967196 }
  0x16   :  { %v65_v10 = vsel %vm194_vm3, 0, %v184_v6  ;;  %vm202_vm5 = vmor %vm60_vm2, %vm62_vm4  ;;  %v69_v26 = vadd.s32 128, %v68_v22 }
  0x17   :  { %71 = vperm.xlu1 %112, %v65_v10   ;;  %v66_v12 = vsel %vm202_vm5, 0, %v189_v7 }
  0x19   :  { %35 = vmax.xlane.f32.xlu0 %v34_v8 }
  0x1b   :  { %74 = vperm.xlu1 %112, %v66_v12  }
  0x96   :  { %v72_v25 = vpop.permute.xlu1 %71 }
  0x97   :  { %vm76_vm6 = vcmp.eq.s32.totalorder %v68_v22, %v72_v25  ;;  %vm77_vm7 = vcmp.eq.s32.totalorder %v69_v26, %v72_v25 }
  0x98   :  { %v80_v30 = vsel %vm76_vm6, %v25_v1, 0.0  ;;  %v81_v31 = vsel %vm77_vm7, %v26_v2, 0.0 }
  0x99   :  { %v84_v34 = vadd.f32 %v81_v31, %v80_v30 }
  0x9a   :  { %v75_v27 = vpop.permute.xlu1 %74 }
  0x9b   :  { %vm78_vm8 = vcmp.eq.s32.totalorder %v68_v22, %v75_v27  ;;  %vm79_vm9 = vcmp.eq.s32.totalorder %v69_v26, %v75_v27 }
  0x9c   :  { %v82_v36 = vsel %vm78_vm8, %v27_v3, 0.0  ;;  %v83_v37 = vsel %vm79_vm9, %v28_v5, 0.0 }
  0x9d   :  { %v87_v39 = vadd.f32 %v83_v37, %v82_v36 }
  0xa2   :  { %v33_v13 = vpop.xlane.xlu0 %32 }
  0xa3   :  { %v37_v14 = vsub.f32 %v25_v1, %v33_v13  ;;  %v38_v15 = vsub.f32 %v26_v2, %v33_v13 }
  0xa5   :  { %v41_v17 = vmul.f32 1.442695, %v37_v14  ;;  %v43_v18 = vmul.f32 1.442695, %v38_v15 }
  0xa6   :  { %v36_v19 = vpop.xlane.xlu0 %35 }
  0xa7   :  { %114 = vpow2.f32 %v41_v17  ;;  %v39_v20 = vsub.f32 %v27_v3, %v36_v19  ;;  %v40_v21 = vsub.f32 %v28_v5, %v36_v19 }
  0xa8   :  { %116 = vpow2.f32 %v43_v18 }
  0xa9   :  { %v45_v23 = vmul.f32 1.442695, %v39_v20  ;;  %v47_v24 = vmul.f32 1.442695, %v40_v21 }
  0xab   :  { %118 = vpow2.f32 %v45_v23 }
  0xac   :  { %120 = vpow2.f32 %v47_v24 }
  0xb1   :  { %v115_v28 = vpop.eup %114 }
  0xb2   :  { %v117_v29 = vpop.eup %116 }
  0xb3   :  { %v49_v32 = vadd.f32 %v117_v29, %v115_v28 }
  0xb5   :  { %v119_v33 = vpop.eup %118  ;;  %50 = vadd.xlane.f32.xlu0 %v49_v32 }
  0xb6   :  { %v121_v35 = vpop.eup %120 }
  0xb7   :  { %v52_v38 = vadd.f32 %v121_v35, %v119_v33 }
  0xb9   :  { %85 = vadd.xlane.f32.xlu0 %v84_v34  ;;  %53 = vadd.xlane.f32.xlu1 %v52_v38 }
  0xbd   :  { %88 = vadd.xlane.f32.xlu0 %v87_v39 }
 0x142   :  { %v51_v40 = vpop.xlane.xlu0 %50 }
 0x143   :  { %122 = vlog2.f32 %v51_v40 }
 0x146   :  { %v54_v41 = vpop.xlane.xlu1 %53  ;;  %v86_v42 = vpop.xlane.xlu0 %85 }
 0x147   :  { %124 = vlog2.f32 %v54_v41  ;;  %v90_v43 = vsub.f32 %v86_v42, %v33_v13 }
 0x149   :  { %v92_v47 = vsel %vm194_vm3, 0.0, %v90_v43 }
 0x14a   :  { %v89_v44 = vpop.xlane.xlu0 %88 }
 0x14b   :  { %v91_v48 = vsub.f32 %v89_v44, %v36_v19 }
 0x14d   :  { %v123_v45 = vpop.eup %122  ;;  %v93_v53 = vsel %vm202_vm5, 0.0, %v91_v48 }
 0x14e   :  { %v56_v46 = vmul.f32 0.6931472, %v123_v45 }
 0x150   :  { %v94_v49 = vsub.f32 %v56_v46, %v92_v47 }
 0x151   :  { %v125_v50 = vpop.eup %124 }
 0x152   :  { %v58_v51 = vmul.f32 0.6931472, %v125_v50  ;;  %v98_v52 = vsel %vm96_vm10, 0.0, %v94_v49 }
 0x153   :  { %101 = vst.msk [vmem:[%s223_s2] sm:$0xff] %vm100_vm11, %v98_v52 }
 0x154   :  { %v95_v54 = vsub.f32 %v58_v51, %v93_v53 }
 0x156   :  { %v99_v55 = vsel %vm97_vm12, 0.0, %v95_v54 }
 0x157   :  { %102 = vst.msk [vmem:[%s223_s2 + $0x8] sm:$0xff] %vm100_vm11, %v99_v55 }
 0x158   :  { %107 = vsyncpa [#allocation3], 1 }

</bundles_post_ra>
